<compile_context>
chip_gen: v7x
topology: tpu7x:2x2x1
jax: 0.10.0
libtpu: 0.0.40
codegen_flags: <defaults>
</compile_context>

<pallas_src>
import numpy as np
import jax
import jax.numpy as jnp
from jax.experimental import pallas as pl
from jax.experimental.pallas import tpu as pltpu


# --------------------------------------------------------------------------- tiling
def _pick_row_tile(rows, row_bytes, budget_bytes=2 << 20, min_blocks=2):
    """Row-block size for a (rows, lanes) array (rows sit on sublanes): multiple of 8,
    divides `rows`, block <= budget, and leaves >= `min_blocks` grid steps when
    possible so v7x can shard the 'parallel' axis across its 2 TensorCores."""
    if rows % 8 != 0:
        # Full-dim block (exempt from the (8,128) tiling rule).
        # TODO(synk): pad rows to a multiple of 8 for very large, awkward shapes.
        return rows
    cap = max(8, min(rows, (budget_bytes // max(row_bytes, 1)) // 8 * 8))
    split_cap = (rows // min_blocks) // 8 * 8
    if split_cap >= 8:
        cap = min(cap, split_cap)
    for cand in range(cap, 7, -8):
        if rows % cand == 0:
            return cand
    return 8


def _pick_leading_tile(rows, row_bytes, budget_bytes=2 << 20, min_blocks=2):
    """Block size along a leading (non-tiled) dim: any divisor of `rows`, block under
    budget, and >= `min_blocks` grid steps whenever the row count allows it."""
    best = 1
    for d in range(1, rows + 1):
        if rows % d:
            continue
        if d * row_bytes > budget_bytes:
            break
        if rows >= min_blocks and rows // d < min_blocks:
            continue
        best = d
    return best


# ---------------- stride == 1 : y = x * 0.0 (lane-dense, single pass) ----------------
def _zero_mul_kernel(x_ref, o_ref):
    # Strict torch.mul(0.0) semantics: NaN/Inf propagate, signed zeros preserved,
    # so the input read is required (path is HBM-bound and already near roofline).
    o_ref[...] = x_ref[...] * 0.0


def _zero_mul(x):
    total = x.size
    if total % 128 == 0:
        x2 = x.reshape(total // 128, 128)            # lane-dense, splittable rows
    else:
        x2 = x.reshape(x.shape[0] * x.shape[1], -1)  # fallback 2D view
    T, L = x2.shape
    rt = _pick_row_tile(T, L * x.dtype.itemsize)
    y2 = pl.pallas_call(
        _zero_mul_kernel,
        out_shape=jax.ShapeDtypeStruct((T, L), x.dtype),
        grid=(T // rt,),
        in_specs=[pl.BlockSpec((rt, L), lambda i: (i, 0))],
        out_specs=pl.BlockSpec((rt, L), lambda i: (i, 0)),
        compiler_params=pltpu.CompilerParams(
            dimension_semantics=("parallel",),
            vmem_limit_bytes=32 * 1024 * 1024),
    )(x2)
    return y2.reshape(x.shape)


# ---------------- stride > 1 : y = x[:, :, ::s, ::s] as an exact strided gather ------
def _make_strided_slice_kernel(s, Ho, Wo):
    """Single strided ref load: pure data movement, bit-exact, NaN/Inf-safe."""
    def kernel(x_ref, o_ref):
        o_ref[...] = x_ref[:, pl.ds(0, Ho, stride=s), pl.ds(0, Wo, stride=s)]
    return kernel


def _make_unrolled_slice_kernel(s, Ho, Wo):
    """Fallback using only unit-stride slices / concat (always lowers). Same HBM
    traffic as the strided-load kernel; only in-kernel vreg shuffling differs, and
    the op is HBM-bound so that is hidden."""
    def kernel(x_ref, o_ref):
        for ho in range(Ho):
            row = x_ref[:, ho * s, :]                                    # (rt, W)
            cols = [row[:, wo * s:wo * s + 1] for wo in range(Wo)]       # unit slices
            o_ref[:, ho, :] = jnp.concatenate(cols, axis=1)              # (rt, Wo)
    return kernel


def _probe_strided_ds():
    """True iff strided `pl.ds` loads on the last two (sublane/lane) dims lower AND
    produce correct results on this backend; otherwise use the unrolled kernel."""
    try:
        f = pl.pallas_call(
            _make_strided_slice_kernel(2, 8, 8),
            out_shape=jax.ShapeDtypeStruct((8, 8, 8), jnp.float32),
            grid=(1,),
            in_specs=[pl.BlockSpec((8, 16, 16), lambda i: (i, 0, 0))],
            out_specs=pl.BlockSpec((8, 8, 8), lambda i: (i, 0, 0)),
        )
        xp = jnp.arange(8 * 16 * 16, dtype=jnp.float32).reshape(8, 16, 16)
        got = jax.jit(f)(xp)
        return bool(jnp.array_equal(got, xp[:, ::2, ::2]))
    except Exception:
        return False


_STRIDED_DS_OK = _probe_strided_ds()


def _zero_strided(x, stride):
    B, C, H, W = x.shape
    s = int(stride)
    Ho, Wo = -(-H // s), -(-W // s)                   # ceil-div, matches ::s slicing
    R = B * C
    x3 = x.reshape(R, H, W)                           # rt is a leading (untiled) dim,
    rt = _pick_leading_tile(R, H * W * x.dtype.itemsize)  # so >=2 grid steps for 2 TCs

    mk = _make_strided_slice_kernel if _STRIDED_DS_OK else _make_unrolled_slice_kernel
    # Output block spans the full (Ho, Wo) spatial dims -> the writeback DMA is one
    # fully contiguous HBM chunk per row block even though Wo < 128 lanes.
    y3 = pl.pallas_call(
        mk(s, Ho, Wo),
        out_shape=jax.ShapeDtypeStruct((R, Ho, Wo), x.dtype),
        grid=(R // rt,),
        in_specs=[pl.BlockSpec((rt, H, W), lambda i: (i, 0, 0))],
        out_specs=pl.BlockSpec((rt, Ho, Wo), lambda i: (i, 0, 0)),
        compiler_params=pltpu.CompilerParams(
            dimension_semantics=("parallel",),
            vmem_limit_bytes=32 * 1024 * 1024),
    )(x3)
    return y3.reshape(B, C, Ho, Wo)


def zero_forward(x, stride):
    """Forward pass of the PyTorch `Zero(stride)` module for NCHW input."""
    if stride == 1:
        return _zero_mul(x)
    return _zero_strided(x, stride)


if __name__ == "__main__":
    key = jax.random.PRNGKey(0)
    B, C, H, W = 2, 4, 16, 16
    x = jax.random.normal(key, (B, C, H, W), jnp.float32)

    out_s1 = jax.jit(lambda xx: zero_forward(xx, 1))(x)   # Zero(stride=1)
    out_s2 = jax.jit(lambda xx: zero_forward(xx, 2))(x)   # Zero(stride=2)
    jax.block_until_ready((out_s1, out_s2))

    x_np = np.asarray(x)
    np.testing.assert_array_equal(np.asarray(out_s1), x_np * 0.0)
    np.testing.assert_array_equal(np.asarray(out_s2), x_np[:, :, ::2, ::2])
    assert out_s2.shape == (B, C, 8, 8)
    print("KERNEL_OK")
</pallas_src>

<mosaic_0001>
module attributes {stable_mosaic.version = 11 : i64} {
  func.func @kernel(%arg0: i32, %arg1: memref<8x16x16xf32, #tpu.memory_space<vmem>>, %arg2: memref<8x8x8xf32, #tpu.memory_space<vmem>>) attributes {dimension_semantics = [#tpu.dimension_semantics<arbitrary>], iteration_bounds = array<i64: 1>, scalar_prefetch = 0 : i64, scratch_operands = 0 : i64, tpu.core_type = #tpu.core_type<tc>, window_params = [{transform_indices = @transform_0, window_bounds = array<i64: 8, 16, 16>}, {transform_indices = @transform_1, window_bounds = array<i64: 8, 8, 8>}]} {
    %c0 = arith.constant 0 : index
    %c0_0 = arith.constant 0 : index
    %c0_1 = arith.constant 0 : index
    %0 = tpu.strided_load %arg1[%c0, %c0_0, %c0_1] {strides = array<i32: 1, 2, 2>} : memref<8x16x16xf32, #tpu.memory_space<vmem>>, vector<8x8x8xf32>
    %c0_2 = arith.constant 0 : index
    %c0_3 = arith.constant 0 : index
    %c0_4 = arith.constant 0 : index
    %1 = vector.load %arg2[%c0_2, %c0_3, %c0_4] : memref<8x8x8xf32, #tpu.memory_space<vmem>>, vector<8x8x8xf32>
    tpu.vector_store %arg2[%c0_2, %c0_3, %c0_4], %0 {strides = array<i32>} : memref<8x8x8xf32, #tpu.memory_space<vmem>>, vector<8x8x8xf32>,
    return
  }
  func.func @transform_0(%arg0: i32) -> (i32, i32, i32) {
    %c0_i32 = arith.constant 0 : i32
    %c0_i32_0 = arith.constant 0 : i32
    %c0_i32_1 = arith.constant 0 : i32
    return %arg0, %c0_i32, %c0_i32_0 : i32, i32, i32
  }
  func.func @transform_1(%arg0: i32) -> (i32, i32, i32) {
    %c0_i32 = arith.constant 0 : i32
    %c0_i32_0 = arith.constant 0 : i32
    %c0_i32_1 = arith.constant 0 : i32
    return %arg0, %c0_i32, %c0_i32_0 : i32, i32, i32
  }
}

module attributes {stable_mosaic.version = 11 : i64} {
  func.func @_zero_mul_kernel(%arg0: i32, %arg1: memref<8x128xf32, #tpu.memory_space<vmem>>, %arg2: memref<8x128xf32, #tpu.memory_space<vmem>>) attributes {dimension_semantics = [#tpu.dimension_semantics<parallel>], iteration_bounds = array<i64: 2>, scalar_prefetch = 0 : i64, scratch_operands = 0 : i64, tpu.core_type = #tpu.core_type<tc>, window_params = [{transform_indices = @transform_0, window_bounds = array<i64: 8, 128>}, {transform_indices = @transform_1, window_bounds = array<i64: 8, 128>}]} {
    %c0 = arith.constant 0 : index
    %c0_0 = arith.constant 0 : index
    %0 = vector.load %arg1[%c0, %c0_0] : memref<8x128xf32, #tpu.memory_space<vmem>>, vector<8x128xf32>
    %cst = arith.constant 0.000000e+00 : f32
    %1 = vector.broadcast %cst : f32 to vector<8x128xf32>
    %2 = arith.mulf %0, %1 : vector<8x128xf32>
    %c0_1 = arith.constant 0 : index
    %c0_2 = arith.constant 0 : index
    %3 = vector.load %arg2[%c0_1, %c0_2] : memref<8x128xf32, #tpu.memory_space<vmem>>, vector<8x128xf32>
    tpu.vector_store %arg2[%c0_1, %c0_2], %2 {strides = array<i32>} : memref<8x128xf32, #tpu.memory_space<vmem>>, vector<8x128xf32>,
    return
  }
  func.func @transform_0(%arg0: i32) -> (i32, i32) {
    %c0_i32 = arith.constant 0 : i32
    %c0_i32_0 = arith.constant 0 : i32
    return %arg0, %c0_i32 : i32, i32
  }
  func.func @transform_1(%arg0: i32) -> (i32, i32) {
    %c0_i32 = arith.constant 0 : i32
    %c0_i32_0 = arith.constant 0 : i32
    return %arg0, %c0_i32 : i32, i32
  }
}

</mosaic_0001>

<bundles_post_ra>
// kernel: _lambda_.1
= control target key start
LH: loop header
LB: loop body
LE: loop exit
PB: predicated region body
PF: predicated region fallthrough
CT: control target
= control target key end

     0   :  { %s189_s6 = smov 0   ;;  %s209_s0 = inlined_call_operand.vmem [shape: f32[16,128], index: 0, kind: input, shape index: {}]   ;;  %s210_s1 = inlined_call_operand.vmem [shape: f32[16,128], index: 1, kind: output, shape index: {}]  }
   0x1 LB: > { %s168_s7 = sadd.s32 4294967295, %s191_s6   ;;  %p172_p0 = scmp.ge.s32.totalorder %s191_s6, 1  ;;  %s191_s6 = sphi %s189_s6, %s11_s6  }
   0x2   : > { %p86_p1 = scmp.lt.s32.totalorder %s191_s6, 3 }
   0x4   : > { %p87_p2 = pnand %p172_p0, %p86_p1 }
   0x5   : > { %p104_p3 = scmp.lt.s32.totalorder (!%p87_p2), %s168_s7, 1 }
   0x6   : > { %90 = sbr.rel (%p87_p2) target bundleno = 20 (0x14), region = 24 }
   0xd   : > { %s212_s7 = smov (!%p104_p3, %s168_s7), 1 }
   0xe   : > { %s173_s8 = sshll.u32 %s212_s7, 3 }
   0xf   : > { %s107_s11 = scalar_lea.vmem %s209_s0, %s173_s8  ;;  %s111_s14 = scalar_lea.vmem %s210_s1, %s173_s8 }
  0x10   : > { %v112_v0 = vld [vmem:[%s107_s11] sm:$0xff] }
  0x11   : > { %v113_v1 = vmul.f32 0.0, %v112_v0 }
  0x13   : > { %114 = vst [vmem:[%s111_s14] sm:$0xff] %v113_v1 }
  0x14 PF: > { %s11_s6 = sadd.s32 1, %s191_s6  }
  0x15   : > { %p8_p4 = scmp.ge.s32.totalorder %s11_s6, 4  }
  0x17   :  { %10 = sbr.rel (!%p8_p4) target bundleno = 1 (0x1), region = 54 }

</bundles_post_ra>
